<compile_context>
chip_gen: v7x
topology: tpu7x:2x2x1
jax: 0.10.0
libtpu: 0.0.40
codegen_flags: <defaults>
</compile_context>

<pallas_src>
import functools

import jax
import jax.numpy as jnp
from jax.experimental import pallas as pl
from jax.experimental.pallas import tpu as pltpu


def _rope_kernel_fulllane(pos_ref, invf_ref, cos_ref, sin_ref, *, scaling):
    # pos_ref:  (1, TILE_S, 1)  f32 positions for this (batch, seq-tile)
    # invf_ref: (1, dim)        f32 inv_freq duplicated along the last axis
    # cos_ref / sin_ref: (1, TILE_S, dim) outputs
    pos = pos_ref[0]                  # (TILE_S, 1)
    invf = invf_ref[...]              # (1, dim)
    emb = pos * invf                  # (TILE_S, dim), full-lane broadcast mul
    cos = jnp.cos(emb)
    sin = jnp.sin(emb)
    if scaling != 1.0:                # static (trace-time) skip for the common case
        cos = cos * scaling
        sin = sin * scaling
    cos_ref[0] = cos.astype(cos_ref.dtype)
    sin_ref[0] = sin.astype(sin_ref.dtype)


def _rope_kernel_halfsym(pos_ref, invf_ref, cos_ref, sin_ref, *, scaling, half):
    # pos_ref:  (1, TILE_S, 1)  f32 positions
    # invf_ref: (1, half)       f32 inverse frequencies
    # cos_ref / sin_ref: (1, TILE_S, 2*half) outputs
    pos = pos_ref[0]                  # (TILE_S, 1)
    invf = invf_ref[...]              # (1, half)
    freqs = pos * invf                # (TILE_S, half)
    c = jnp.cos(freqs)                # single EUP pass over half width
    s = jnp.sin(freqs)
    if scaling != 1.0:
        c = c * scaling
        s = s * scaling
    c = c.astype(cos_ref.dtype)
    s = s.astype(sin_ref.dtype)
    # emb = cat((freqs, freqs), -1) -> cos/sin halves are identical; store twice.
    cos_ref[0, :, 0:half] = c
    cos_ref[0, :, half:2 * half] = c
    sin_ref[0, :, 0:half] = s
    sin_ref[0, :, half:2 * half] = s


def llama_rotary_embedding(x, position_ids, inv_freq, attention_scaling=1.0,
                           tile_s=512):
    """Pallas implementation of LlamaRotaryEmbedding.forward.

    x:            (..., dim) — only supplies the output dtype (as in PyTorch).
    position_ids: (B, S) integer positions.
    inv_freq:     (dim // 2,) float32.
    Returns (cos, sin), each (B, S, dim) in x.dtype.
    """
    B, S = position_ids.shape
    half = int(inv_freq.shape[0])
    dim = 2 * half
    out_dtype = x.dtype
    scaling = float(attention_scaling)

    # Sequence tile: big enough to amortize per-step overhead, small enough to
    # stay well inside the 32 MiB default scoped VMEM (and v7x's 64 MiB total).
    TILE_S = min(int(tile_s), S)
    if TILE_S != S and TILE_S % 8 != 0:
        TILE_S = S  # fall back to a single full-S block (satisfies (8,128) rule)
    n_s = pl.cdiv(S, TILE_S)

    # Wrapper-side reshape (metadata-only): positions as a column so the kernel
    # does a lane-broadcast multiply instead of a lane->sublane transpose.
    pos_f32 = position_ids.astype(jnp.float32).reshape(B, S, 1)

    use_halfsym = half >= 128
    if use_halfsym:
        # Half >= one full lane width: halve transcendental work via symmetry.
        invf = inv_freq.astype(jnp.float32).reshape(1, half)
        kernel = functools.partial(_rope_kernel_halfsym, scaling=scaling, half=half)
        invf_spec = pl.BlockSpec((1, half), lambda b, s: (0, 0))
    else:
        # Small head dim: pre-duplicate inv_freq -> full-lane kernel, no concat.
        invf = jnp.concatenate([inv_freq, inv_freq]).astype(jnp.float32).reshape(1, dim)
        kernel = functools.partial(_rope_kernel_fulllane, scaling=scaling)
        invf_spec = pl.BlockSpec((1, dim), lambda b, s: (0, 0))

    out_shape = (
        jax.ShapeDtypeStruct((B, S, dim), out_dtype),
        jax.ShapeDtypeStruct((B, S, dim), out_dtype),
    )

    cos, sin = pl.pallas_call(
        kernel,
        out_shape=out_shape,
        grid_spec=pltpu.PrefetchScalarGridSpec(
            num_scalar_prefetch=0,
            grid=(B, n_s),
            in_specs=[
                pl.BlockSpec((1, TILE_S, 1), lambda b, s: (b, s, 0)),  # positions tile
                invf_spec,                                             # shared inv_freq
            ],
            out_specs=[
                pl.BlockSpec((1, TILE_S, dim), lambda b, s: (b, s, 0)),
                pl.BlockSpec((1, TILE_S, dim), lambda b, s: (b, s, 0)),
            ],
        ),
        compiler_params=pltpu.CompilerParams(
            dimension_semantics=("parallel", "parallel"),
        ),
    )(pos_f32, invf)

    return cos, sin


def _reference(x, position_ids, inv_freq, attention_scaling=1.0):
    # Pure-JAX reference mirroring the PyTorch forward exactly.
    inv_freq_expanded = inv_freq[None, :, None].astype(jnp.float32)
    inv_freq_expanded = jnp.broadcast_to(
        inv_freq_expanded, (position_ids.shape[0], inv_freq.shape[0], 1)
    )
    position_ids_expanded = position_ids[:, None, :].astype(jnp.float32)
    freqs = jnp.matmul(inv_freq_expanded, position_ids_expanded).transpose(0, 2, 1)
    emb = jnp.concatenate([freqs, freqs], axis=-1)
    cos = jnp.cos(emb) * attention_scaling
    sin = jnp.sin(emb) * attention_scaling
    return cos.astype(x.dtype), sin.astype(x.dtype)


if __name__ == "__main__":
    key = jax.random.PRNGKey(0)

    # Small shapes: batch=2, seq=8, head_dim=32.
    B, S, dim = 2, 8, 32
    base = 10000.0
    attention_scaling = 1.0  # default rope_type -> scaling 1.0

    # Default RoPE inverse frequencies (deterministic "parameter" init).
    inv_freq = 1.0 / (
        base ** (jnp.arange(0, dim, 2, dtype=jnp.float32) / dim)
    )  # (dim//2,)

    # x only supplies the output dtype in the PyTorch module.
    k1, _ = jax.random.split(key)
    x = jax.random.normal(k1, (B, S, dim), dtype=jnp.float32)
    position_ids = jnp.broadcast_to(
        jnp.arange(S, dtype=jnp.int32)[None, :], (B, S)
    )

    cos, sin = llama_rotary_embedding(x, position_ids, inv_freq, attention_scaling)
    cos = jax.block_until_ready(cos)
    sin = jax.block_until_ready(sin)

    cos_ref, sin_ref = _reference(x, position_ids, inv_freq, attention_scaling)
    assert cos.shape == (B, S, dim) and sin.shape == (B, S, dim)
    assert cos.dtype == x.dtype and sin.dtype == x.dtype
    assert jnp.allclose(cos, cos_ref, atol=1e-5, rtol=1e-5)
    assert jnp.allclose(sin, sin_ref, atol=1e-5, rtol=1e-5)

    print("KERNEL_OK")
</pallas_src>

<mosaic_0001>
module attributes {stable_mosaic.version = 11 : i64} {
  func.func @_rope_kernel_fulllane(%arg0: i32, %arg1: i32, %arg2: memref<1x8x1xf32, #tpu.memory_space<vmem>>, %arg3: memref<1x32xf32, #tpu.memory_space<vmem>>, %arg4: memref<1x8x32xf32, #tpu.memory_space<vmem>>, %arg5: memref<1x8x32xf32, #tpu.memory_space<vmem>>) attributes {dimension_semantics = [#tpu.dimension_semantics<parallel>, #tpu.dimension_semantics<parallel>], iteration_bounds = array<i64: 2, 1>, scalar_prefetch = 0 : i64, scratch_operands = 0 : i64, tpu.core_type = #tpu.core_type<tc>, window_params = [{transform_indices = @transform_0, window_bounds = array<i64: 1, 8, 1>}, {pipeline_mode = #tpu.pipeline_mode<synchronous>, transform_indices = @transform_1, window_bounds = array<i64: 1, 32>}, {transform_indices = @transform_2, window_bounds = array<i64: 1, 8, 32>}, {transform_indices = @transform_3, window_bounds = array<i64: 1, 8, 32>}]} {
    %c0 = arith.constant 0 : index
    %c0_0 = arith.constant 0 : index
    %c0_1 = arith.constant 0 : index
    %0 = vector.load %arg2[%c0, %c0_0, %c0_1] : memref<1x8x1xf32, #tpu.memory_space<vmem>>, vector<1x8x1xf32>
    %1 = vector.shape_cast %0 : vector<1x8x1xf32> to vector<8x1xf32>
    %c0_2 = arith.constant 0 : index
    %c0_3 = arith.constant 0 : index
    %2 = vector.load %arg3[%c0_2, %c0_3] : memref<1x32xf32, #tpu.memory_space<vmem>>, vector<1x32xf32>
    %3 = vector.broadcast %1 : vector<8x1xf32> to vector<8x32xf32>
    %4 = vector.broadcast %2 : vector<1x32xf32> to vector<8x32xf32>
    %5 = arith.mulf %3, %4 : vector<8x32xf32>
    %6 = math.cos %5 : vector<8x32xf32>
    %7 = math.sin %5 : vector<8x32xf32>
    %c0_4 = arith.constant 0 : index
    %c0_5 = arith.constant 0 : index
    %c0_6 = arith.constant 0 : index
    %8 = vector.load %arg4[%c0_4, %c0_5, %c0_6] : memref<1x8x32xf32, #tpu.memory_space<vmem>>, vector<1x8x32xf32>
    %9 = vector.shape_cast %8 : vector<1x8x32xf32> to vector<8x32xf32>
    %10 = vector.shape_cast %6 : vector<8x32xf32> to vector<1x8x32xf32>
    tpu.vector_store %arg4[%c0_4, %c0_5, %c0_6], %10 {strides = array<i32>} : memref<1x8x32xf32, #tpu.memory_space<vmem>>, vector<1x8x32xf32>,
    %c0_7 = arith.constant 0 : index
    %c0_8 = arith.constant 0 : index
    %c0_9 = arith.constant 0 : index
    %11 = vector.load %arg5[%c0_7, %c0_8, %c0_9] : memref<1x8x32xf32, #tpu.memory_space<vmem>>, vector<1x8x32xf32>
    %12 = vector.shape_cast %11 : vector<1x8x32xf32> to vector<8x32xf32>
    %13 = vector.shape_cast %7 : vector<8x32xf32> to vector<1x8x32xf32>
    tpu.vector_store %arg5[%c0_7, %c0_8, %c0_9], %13 {strides = array<i32>} : memref<1x8x32xf32, #tpu.memory_space<vmem>>, vector<1x8x32xf32>,
    return
  }
  func.func @transform_0(%arg0: i32, %arg1: i32) -> (i32, i32, i32) {
    %c0_i32 = arith.constant 0 : i32
    %c0_i32_0 = arith.constant 0 : i32
    return %arg0, %arg1, %c0_i32 : i32, i32, i32
  }
  func.func @transform_1(%arg0: i32, %arg1: i32) -> (i32, i32) {
    %c0_i32 = arith.constant 0 : i32
    %c0_i32_0 = arith.constant 0 : i32
    %c0_i32_1 = arith.constant 0 : i32
    return %c0_i32, %c0_i32_0 : i32, i32
  }
  func.func @transform_2(%arg0: i32, %arg1: i32) -> (i32, i32, i32) {
    %c0_i32 = arith.constant 0 : i32
    %c0_i32_0 = arith.constant 0 : i32
    return %arg0, %arg1, %c0_i32 : i32, i32, i32
  }
  func.func @transform_3(%arg0: i32, %arg1: i32) -> (i32, i32, i32) {
    %c0_i32 = arith.constant 0 : i32
    %c0_i32_0 = arith.constant 0 : i32
    return %arg0, %arg1, %c0_i32 : i32, i32, i32
  }
}

</mosaic_0001>

<bundles_post_ra>
// kernel: tpu_custom_call.1
= control target key start
LH: loop header
LB: loop body
LE: loop exit
PB: predicated region body
PF: predicated region fallthrough
CT: control target
= control target key end

     0   :  { %9 = vsyncpa [#allocation3], 0  ;;  %s977_s0 = inlined_call_operand.vmem [shape: f32[2,8,1], index: 0, kind: input, shape index: {}]   ;;  %s978_s1 = inlined_call_operand.vmem [shape: f32[1,32], index: 1, kind: input, shape index: {}]   ;;  %s979_s2 = inlined_call_operand.hbm [shape: f32[2,8,32], index: 2, kind: output, shape index: {0}]   ;;  %s980_s3 = inlined_call_operand.hbm [shape: f32[2,8,32], index: 3, kind: output, shape index: {1}]  }
   0x1   :  { %11 = vsyncpa [#allocation3 + $0x1], 0 }
   0x2   :  { %12 = vsyncpa [#allocation5], 0 }
   0x3   :  { %14 = vsyncpa [#allocation5 + $0x1], 0  ;;  %s806_s12 = smov 0   ;;  %s808_s13 = smov 0  }
   0x4   :  { %s810_s14 = smov 0   ;;  %s812_s15 = smov 0  }
   0x5   :  { %s814_s16 = smov 0   ;;  %s816_s17 = smov 0  }
   0x6 LB: > { %s566_s18 = sadd.s32 4294967295, %s775_s17   ;;  %s567_s19 = sadd.s32 4294967294, %s775_s17   ;;  %s775_s17 = sphi %s816_s17, %s20_s17   ;;  %s771_s16 = sphi %s814_s16, %s987_s16   ;;  %s767_s15 = sphi %s812_s15, %s986_s15   ;;  %s763_s14 = sphi %s810_s14, %s985_s14   ;;  %s759_s13 = sphi %s808_s13, %s984_s13   ;;  %s755_s12 = sphi %s806_s12, %s983_s12  }
   0x7   : > { %s32_s20 = sadd.s32 1, %s771_s16  ;;  %s90_s21 = sadd.s32 1, %s763_s14 }
   0x8   : > { %p34_p0 = scmp.ge.s32.totalorder %s32_s20, 2  ;;  %p100_p1 = scmp.ne.s32.totalorder %s763_s14, %s759_s13 }
   0x9   : > { %p101_p2 = scmp.eq.s32.totalorder %s566_s18, 1  ;;  %p106_p3 = scmp.ne.s32.totalorder %s759_s13, %s755_s12 }
   0xa   : > { %s989_s20 = smov (%p34_p0, %s32_s20), 0  ;;  %p107_p5 = scmp.eq.s32.totalorder %s567_s19, 1 }
   0xb   : > { %p846_p4 = por %p101_p2, %p100_p1  ;;  %s85_s23 = ssub.s32 %s771_s16, %s989_s20 }
   0xc   : > { %p570_p6 = scmp.ge.s32.totalorder %s775_s17, 1  ;;  %p88_p7 = scmp.eq.s32.totalorder %s85_s23, 0 }
   0xd   : > { %p853_p8 = por %p107_p5, %p106_p3  ;;  %p166_p9 = scmp.lt.s32.totalorder %s775_s17, 3 }
   0xe   : > { %s859_s25 = scalar_select %p88_p7, %s763_s14, %s90_s21  }
   0xf   : > { %p167_p10 = pnand %p570_p6, %p166_p9 }
  0x10   : > { %p197_p11 = scmp.lt.s32.totalorder (!%p167_p10), %s767_s15, 1  ;;  %v777_v0 = vmov (!%p167_p10), 0   ;;  %v574_v2 = vld [vmem:[%s978_s1] ss:$0 sm:$0xff] (!%p167_p10)  ;;  %v778_v15 = vmov (!%p167_p10), 683565275  }
  0x11   : > { %170 = sbr.rel (%p167_p10) target bundleno = 275 (0x113), region = 28  ;;  %660 = vset.pattern.permute.xlu0 (!%p167_p10), %v777_v0  ;;  %v779_v17 = vmov (!%p167_p10), 2475754826   ;;  %v780_v20 = vmov (!%p167_p10), 2131351028   ;;  %s890_s6 = sand.u32 (!%p167_p10), 1, %s759_s13  }
  0x12   : > { %v781_v23 = vmov (!%p167_p10), 2102212464   ;;  %v782_v26 = vmov (!%p167_p10), 920167782   ;;  %v783_v29 = vmov (!%p167_p10), 1326507024  }
  0x13   : > { %s571_s7 = sshll.u32 (!%p167_p10), %s890_s6, 3  ;;  %s585_s8 = sshll.u32 (!%p167_p10), %s767_s15, 7  ;;  %vm425_vm10 = vcmask (!%p167_p10), 261120  }
  0x14   : > { %s189_s9 = scalar_lea.vmem (!%p167_p10), [#allocation2], %s571_s7  ;;  %s196_s11 = scalar_lea.vmem (!%p167_p10), [#allocation4], %s571_s7 }
  0x15   : > { %s448_s10 = sshll.u32 (!%p167_p10), %s189_s9, 4  ;;  %s462_s18 = sshll.u32 (!%p167_p10), %s196_s11, 4  ;;  %s900_s10 = int_to_ptr.vmem [resolvable:$true] %s448_s10  ;;  %s907_s18 = int_to_ptr.vmem [resolvable:$true] %s462_s18 }
  0x16   : > { %s897_s23 = scalar_lea.hbm (!%p167_p10), %s979_s2, %s585_s8  ;;  %s429_s28 = scalar_lea.sflag (!%p167_p10), [#allocation3], %s890_s6 }
  0x17   : > { %s665_s29 = scalar_lea.vmem (!%p167_p10), %s900_s10, 128 }
  0x18   : > { %s198_s26 = scalar_select %p197_p11, %s767_s15, 1 }
  0x19   : > { %p666_p12 = scmp.ne.s32.totalorder %s900_s10, %s665_s29 }
  0x1a   : > { %s573_s27 = sshll.u32 %s198_s26, 3 }
  0x1b   : > { %s203_s30 = scalar_lea.vmem %s977_s0, %s573_s27  ;;  %s905_s27 = scalar_lea.hbm %s980_s3, %s585_s8 }
  0x1c   : > { %v204_v1 = vld [vmem:[%s203_s30] sm:$0xff]  ;;  %p667_p13 = pnand %p666_p12, %p846_p4  ;;  %s784_s30 = smov [#allocation2]  }
  0x1d   : > { %208 = vperm.xlu0 %660, %v204_v1   ;;  %s669_s4 = sshll.u32 %s784_s30, 4  ;;  %s670_s4 = int_to_ptr.vmem [resolvable:$false] %s669_s4 }
  0x1e   : > { %p668_p0 = pneg %p667_p13  ;;  %s671_s5 = scalar_lea.vmem %s670_s4, 256 }
  0x1f   : > { %p672_p1 = scmp.lt.s32.totalorder %s900_s10, %s670_s4  ;;  %p673_p2 = scmp.lt.s32.totalorder %s671_s5, %s665_s29 }
  0x21   : > { %p674_p3 = por %p673_p2, %p672_p1 }
  0x23   : > { %p675_p5 = pnand %p674_p3, %p668_p0 }
  0x9c   : > { %v209_v3 = vpop.permute.xlu0 %208 }
  0x9d   : > { %v869_v4 = vmul.f32 %v574_v2, %v209_v3 }
  0x9f   : > { %v221_v5 = vand.u32 2139095040, %v869_v4  ;;  %v218_v9 = vand.u32 2147483647, %v869_v4  ;;  %vm220_vm7 = vcmp.lt.s32.totalorder %v869_v4, 0 }
  0xa1   : > { %v222_v6 = vshrl.u32 %v221_v5, 23  ;;  %v225_v12 = vand.u32 8388607, %v218_v9  ;;  %vm219_vm8 = vcmp.le.f32.partialorder %v218_v9, 0.7853982 }
  0xa3   : > { %v575_v7 = vadd.s32 4294967169, %v222_v6  ;;  %v226_v31 = vor.u32 8388608, %v225_v12 }
  0xa5   : > { %v228_v8 = vadd.s32 1, %v575_v7  ;;  %v266_v45 = vshll.u32 %v226_v31, 8 }
  0xa7   : > { %vm229_vm0 = vcmp.gt.s32.totalorder %v228_v8, 0 }
  0xa8   : > { %v230_v10 = vsel %vm229_vm0, %v228_v8, 0  ;;  %vm310_vm0 = vweird.f32 %v869_v4 }
  0xa9   : > { %v232_v11 = vand.u32 31, %v230_v10  ;;  %v231_v14 = vshrl.u32 %v230_v10, 5 }
  0xab   : > { %v233_v13 = vsub.s32 32, %v232_v11  ;;  %v235_v16 = vshll.u32 %v778_v15, %v232_v11  ;;  %v238_v18 = vshll.u32 %v779_v17, %v232_v11  ;;  %v241_v22 = vshll.u32 %v780_v20, %v232_v11 }
  0xac   : > { %v244_v25 = vshll.u32 %v781_v23, %v232_v11  ;;  %v247_v28 = vshll.u32 %v782_v26, %v232_v11  ;;  %vm250_vm1 = vcmp.lt.s32.totalorder %v231_v14, 1  ;;  %vm253_vm2 = vcmp.lt.s32.totalorder %v231_v14, 4 }
  0xad   : > { %v236_v19 = vshrl.u32 %v779_v17, %v233_v13  ;;  %v239_v21 = vshrl.u32 %v780_v20, %v233_v13  ;;  %v242_v24 = vshrl.u32 %v781_v23, %v233_v13  ;;  %v245_v27 = vshrl.u32 %v782_v26, %v233_v13 }
  0xae   : > { %v248_v30 = vshrl.u32 %v783_v29, %v233_v13  ;;  %v234_v40 = vshrl.u32 %v778_v15, %v233_v13  ;;  %vm252_vm3 = vcmp.lt.s32.totalorder %v231_v14, 3  ;;  %vm251_vm4 = vcmp.lt.s32.totalorder %v231_v14, 2 }
  0xaf   : > { %v237_v32 = vor.u32 %v236_v19, %v235_v16  ;;  %v240_v33 = vor.u32 %v239_v21, %v238_v18  ;;  %v243_v34 = vor.u32 %v242_v24, %v241_v22  ;;  %v246_v35 = vor.u32 %v245_v27, %v244_v25 }
  0xb0   : > { %v249_v36 = vor.u32 %v248_v30, %v247_v28 }
  0xb1   : > { %v255_v37 = vsel %vm253_vm2, %v243_v34, 2102212464  ;;  %v258_v38 = vsel %vm250_vm1, %v237_v32, %v240_v33  ;;  %v262_v39 = vsel %vm250_vm1, %v240_v33, %v243_v34  ;;  %v259_v41 = vsel %vm253_vm2, %v246_v35, 920167782 }
  0xb2   : > { %v263_v42 = vsel %vm253_vm2, %v249_v36, 1326507024  ;;  %v260_v43 = vsel %vm252_vm3, %v243_v34, %v259_v41  ;;  %v254_v46 = vsel %vm250_vm1, %v234_v40, %v237_v32  ;;  %v256_v47 = vsel %vm252_vm3, %v240_v33, %v255_v37 }
  0xb3   : > { %v264_v44 = vsel %vm252_vm3, %v246_v35, %v263_v42  ;;  %v261_v48 = vsel %vm251_vm4, %v258_v38, %v260_v43  ;;  %v257_v54 = vsel %vm251_vm4, %v254_v46, %v256_v47 }
  0xb4   : > { %v265_v49 = vsel %vm251_vm4, %v262_v39, %v264_v44  ;;  %v878_v52 = vmul.u32.u64.low %v266_v45, %v261_v48  ;;  %v879_v53 = vmul.u32.u64.high %v266_v45, %v261_v48, %v878_v52  ;;  %v273_v56 = vmul.u32 %v266_v45, %v257_v54 }
  0xb5   : > { %v875_v50 = vmul.u32.u64.low %v266_v45, %v265_v49  ;;  %v876_v51 = vmul.u32.u64.high %v266_v45, %v265_v49, %v875_v50 }
  0xb6   : > { %v276_v55 = vadd.s32 1, %v879_v53 }
  0xb7   : > { %vm275_vm5 = vc.u32 %v876_v51, %v878_v52  ;;  %v274_v5 = vadd.s32 %v878_v52, %v876_v51 }
  0xb8   : > { %v277_v57 = vsel %vm275_vm5, %v276_v55, %v879_v53 }
  0xb9   : > { %v278_v58 = vadd.s32 %v277_v57, %v273_v56 }
  0xbb   : > { %v279_v59 = vadd.s32 536870912, %v278_v58 }
  0xbd   : > { %v280_v60 = vshrl.u32 %v279_v59, 30 }
  0xbf   : > { %v281_v61 = vshll.u32 %v280_v60, 30  ;;  %v304_v18 = vsub.s32 4, %v280_v60 }
  0xc1   : > { %v282_v62 = vsub.s32 %v278_v58, %v281_v61  ;;  %v305_v21 = vsel %vm220_vm7, %v304_v18, %v280_v60 }
  0xc2   : > { %v307_v23 = vsel %vm219_vm8, 0, %v305_v21 }
  0xc3   : > { %v284_v63 = vsub.s32 0, %v282_v62  ;;  %v414_v24 = vadd.s32 3, %v307_v23  ;;  %v311_v25 = vand.u32 3, %v307_v23 }
  0xc5   : > { %v576_v0 = vmin.u32 %v284_v63, %v282_v62  ;;  %v415_v26 = vand.u32 3, %v414_v24  ;;  %vm316_vm9 = vcmp.eq.s32.totalorder %v311_v25, 2  ;;  %vm313_vm12 = vcmp.eq.s32.totalorder %v311_v25, 0 }
  0xc6   : > { %vm312_vm14 = vcmp.lt.s32.totalorder %v311_v25, 2 }
  0xc7   : > { %v286_v1 = vclz %v576_v0  ;;  %vm420_vm11 = vcmp.eq.s32.totalorder %v415_v26, 2  ;;  %vm417_vm13 = vcmp.eq.s32.totalorder %v415_v26, 0  ;;  %vm416_vm15 = vcmp.lt.s32.totalorder %v415_v26, 2 }
  0xc9   : > { %v577_v2 = vadd.s32 4294967294, %v286_v1 }
  0xcb   : > { %vm578_vm6 = vcmp.lt.s32.totalorder %v577_v2, 0 }
  0xcc   : > { %v289_v3 = vsel %vm578_vm6, 0, %v577_v2 }
  0xcd   : > { %v290_v6 = vsub.s32 32, %v289_v3  ;;  %v294_v7 = vsub.s32 4294967266, %v289_v3  ;;  %v291_v8 = vshll.u32 %v282_v62, %v289_v3 }
  0xcf   : > { %v292_v10 = vshrl.u32 %v274_v5, %v290_v6  ;;  %v295_v11 = vadd.s32 127, %v294_v7 }
  0xd1   : > { %v293_v12 = vor.u32 %v292_v10, %v291_v8  ;;  %v296_v13 = vshll.u32 %v295_v11, 23 }
  0xd3   : > { %v297_v14 = vor.u32 4788187, %v296_v13  ;;  %v300_v16 = vcvt.s32.f32 %v293_v12 }
  0xd5   : > { %v298_v15 = vand.u32 2147483647, %v297_v14 }
  0xd7   : > { %v301_v17 = vmul.f32 %v300_v16, %v298_v15 }
  0xd9   : > { %v302_v19 = vxor.u32 2147483648, %v301_v17 }
  0xdb   : > { %v303_v20 = vsel %vm220_vm7, %v302_v19, %v301_v17 }
  0xdc   : > { %v306_v22 = vsel %vm219_vm8, %v869_v4, %v303_v20 }
  0xdd   : > { %661 = vcosq.f32 %v306_v22 }
  0xde   : > { %663 = vsinq.f32 %v306_v22 }
  0xe7   : > { %v662_v27 = vpop.eup %661 }
  0xe8   : > { %v664_v28 = vpop.eup %663  ;;  %v317_v29 = vxor.u32 2147483648, %v662_v27 }
  0xe9   : > { %v314_v30 = vxor.u32 2147483648, %v664_v28 }
  0xea   : > { %v318_v9 = vsel %vm316_vm9, %v317_v29, %v664_v28  ;;  %v422_v31 = vsel %vm420_vm11, %v317_v29, %v664_v28 }
  0xeb   : > { %v315_v32 = vsel %vm313_vm12, %v662_v27, %v314_v30  ;;  %v419_v33 = vsel %vm417_vm13, %v662_v27, %v314_v30 }
  0xec   : > { %v319_v34 = vsel %vm312_vm14, %v315_v32, %v318_v9  ;;  %v423_v35 = vsel %vm416_vm15, %v419_v33, %v422_v31 }
  0xed   : > { %v320_v36 = vsel %vm310_vm0, nan, %v319_v34  ;;  %v424_v37 = vsel %vm310_vm0, nan, %v423_v35 }
  0xee   : > { %426 = vst.msk [vmem:[%s189_s9] sm:$0xff] %vm425_vm10, %v320_v36  ;;  %427 = vst.msk [vmem:[%s196_s11] sm:$0xff] %vm425_vm10, %v424_v37 }
  0xef   : > { %678 = shalt.err (!%p675_p5)
}
  0xf0   : > { %s679_s7 = scalar_lea.hbm %s897_s23, 128  ;;  %s683_s11 = scalar_lea.hbm %s979_s2, 256 }
  0xf1   : > { %p680_p6 = scmp.ne.s32.totalorder %s897_s23, %s679_s7  ;;  %p684_p10 = scmp.lt.u32.totalorder %s897_s23, %s979_s2 }
  0xf2   : > { %p685_p11 = scmp.lt.u32.totalorder %s683_s11, %s679_s7  ;;  %p687_p13 = scmp.lt.u32.totalorder %s679_s7, %s897_s23 }
  0xf3   : > { %p681_p7 = pnand %p680_p6, %p846_p4 }
  0xf4   : > { %p686_p12 = por %p685_p11, %p684_p10 }
  0xf5   : > { %p682_p9 = pneg %p681_p7 }
  0xf6   : > { %p688_p0 = por %p687_p13, %p686_p12 }
  0xf8   : > { %p689_p1 = pnand %p688_p0, %p682_p9 }
  0xfa   : > { %692 = shalt.err (!%p689_p1)
}
  0xfb   : > { %593 = dma.vmem_to_hbm [thread:$0]  (%p846_p4), %s900_s10, 128, %s897_s23, %s429_s28  }
  0xfc   : > { %s434_s15 = scalar_lea.sflag [#allocation5], %s890_s6  ;;  %s693_s26 = scalar_lea.vmem %s907_s18, 128 }
  0xfd   : > { %p694_p2 = scmp.ne.s32.totalorder %s907_s18, %s693_s26  ;;  %s785_s29 = smov [#allocation4]  }
  0xfe   : > { %s697_s30 = sshll.u32 %s785_s29, 4  ;;  %s698_s30 = int_to_ptr.vmem [resolvable:$false] %s697_s30 }
  0xff   : > { %p695_p3 = pnand %p694_p2, %p846_p4  ;;  %s699_s4 = scalar_lea.vmem %s698_s30, 256 }
 0x100   : > { %p700_p6 = scmp.lt.s32.totalorder %s907_s18, %s698_s30  ;;  %p701_p7 = scmp.lt.s32.totalorder %s699_s4, %s693_s26 }
 0x101   : > { %p696_p5 = pneg %p695_p3 }
 0x102   : > { %p702_p9 = por %p701_p7, %p700_p6 }
 0x104   : > { %p703_p10 = pnand %p702_p9, %p696_p5 }
 0x106   : > { %706 = shalt.err (!%p703_p10)
}
 0x107   : > { %s707_s6 = scalar_lea.hbm %s905_s27, 128  ;;  %s711_s28 = scalar_lea.hbm %s980_s3, 256 }
 0x108   : > { %p708_p11 = scmp.ne.s32.totalorder %s905_s27, %s707_s6  ;;  %p712_p0 = scmp.lt.u32.totalorder %s905_s27, %s980_s3 }
 0x109   : > { %p713_p1 = scmp.lt.u32.totalorder %s711_s28, %s707_s6  ;;  %p715_p3 = scmp.lt.u32.totalorder %s707_s6, %s905_s27 }
 0x10a   : > { %p709_p12 = pnand %p708_p11, %p846_p4 }
 0x10b   : > { %p714_p2 = por %p713_p1, %p712_p0 }
 0x10c   : > { %p710_p13 = pneg %p709_p12 }
 0x10d   : > { %p716_p5 = por %p715_p3, %p714_p2 }
 0x10f   : > { %p717_p6 = pnand %p716_p5, %p710_p13 }
 0x111   : > { %720 = shalt.err (!%p717_p6)
}
 0x112   : > { %594 = dma.vmem_to_hbm [thread:$0]  (%p846_p4), %s907_s18, 128, %s905_s27, %s434_s15  }
 0x113 PF: > { %p604_p7 = scmp.ge.s32.totalorder %s775_s17, 2  ;;  %s474_s8 = sand.u32 1, %s755_s12  }
 0x114   : > { %s475_s9 = scalar_lea.sflag [#allocation3], %s474_s8 }
 0x115   : > { %p598_p9 = pnand %p604_p7, %p853_p8 }
 0x117   : > { %746 = dma.done.wait (!%p598_p9), %s475_s9, 128  }
 0x118   : > { %748 = vsyncadd (!%p598_p9), %s475_s9, 4294967168  ;;  %s484_s11 = scalar_lea.sflag [#allocation5], %s474_s8 }
 0x119   : > { %750 = dma.done.wait (!%p598_p9), %s484_s11, 128  }
 0x11a   : > { %752 = vsyncadd (!%p598_p9), %s484_s11, 4294967168  ;;  %s20_s17 = sadd.s32 1, %s775_s17   ;;  %s983_s12 = smov %s759_s13 }
 0x11b   : > { %p17_p10 = scmp.ge.s32.totalorder %s20_s17, 4   ;;  %s984_s13 = smov %s763_s14 }
 0x11c   : > { %s985_s14 = smov %s859_s25  ;;  %s986_s15 = smov %s771_s16 }
 0x11d   : > { %s987_s16 = smov %s989_s20  ;;  %19 = sbr.rel (!%p17_p10) target bundleno = 6 (0x6), region = 80 }
 0x124   :  { %489 = vsyncpa [#allocation3], 1 }
 0x125   :  { %491 = vsyncpa [#allocation3 + $0x1], 1 }
 0x126   :  { %492 = vsyncpa [#allocation5], 1 }
 0x127   :  { %494 = vsyncpa [#allocation5 + $0x1], 1 }

</bundles_post_ra>
